<compile_context>
chip_gen: v5e
topology: v5e:2x2
jax: 0.10.0
libtpu: 0.0.40
codegen_flags: <defaults>
</compile_context>

<pallas_src>
import functools

import jax
import jax.numpy as jnp
from jax.experimental import pallas as pl
from jax.experimental.pallas import tpu as pltpu


# ----------------------------- helpers -----------------------------------


def _round_up(x, m):
    return (x + m - 1) // m * m


def _batch_tile(b, dtype):
    """Batch tile: dtype-aware sublane multiple, capped at 256 (fills 256-wide MXU)."""
    sub = 8 * max(1, 4 // jnp.dtype(dtype).itemsize)   # 8 f32, 16 bf16, 32 int8/fp8
    cap = 256
    if b <= cap:
        return _round_up(b, sub)
    return cap


def _pad_2d(a, rows, cols):
    r, c = a.shape
    if r == rows and c == cols:
        return a
    return jnp.pad(a, ((0, rows - r), (0, cols - c)))


# ----------------------- parameter preparation (once) ----------------------


def prepare_forward_params(W, U, bias):
    """Stack [W ; U] into one contraction matrix and lane-pad each gate block.

    W: (D, 4*HS), U: (HS, 4*HS), bias: (4*HS,)
    Returns WU: (D + HSp, 4*HSp), bias2d: (1, 4*HSp) with HSp = round_up(HS, 128)."""
    D, G = W.shape
    HS = G // 4
    HSp = _round_up(HS, 128)

    def pad_gate_cols(m):                      # (rows, 4*HS) -> (rows, 4*HSp)
        if HSp == HS:
            return m
        blocks = [m[:, k * HS:(k + 1) * HS] for k in range(4)]
        return jnp.concatenate(
            [jnp.pad(b, ((0, 0), (0, HSp - HS))) for b in blocks], axis=1)

    Wp = pad_gate_cols(W)                                       # (D, 4*HSp)
    Up = jnp.pad(pad_gate_cols(U), ((0, HSp - HS), (0, 0)))     # (HSp, 4*HSp)
    WU = jnp.concatenate([Wp, Up], axis=0)                      # (D + HSp, 4*HSp)
    bias2d = pad_gate_cols(bias.reshape(1, G))                  # (1, 4*HSp)
    return WU, bias2d


def prepare_init_params(wh, bh, wc, bc):
    """Pre-transpose + concatenate noise2h / noise2c Linear params.

    wh, wc: (HS, Z) PyTorch layout; bh, bc: (HS,)
    Returns Wz: (Z, 2*HSp), bz: (1, 2*HSp)."""
    HS, Z = wh.shape
    HSp = _round_up(HS, 128)

    def pad_t(w):                              # (HS, Z) -> (Z, HSp)
        return jnp.pad(w.T, ((0, 0), (0, HSp - HS)))

    Wz = jnp.concatenate([pad_t(wh), pad_t(wc)], axis=1)        # (Z, 2*HSp)
    bz = jnp.concatenate([jnp.pad(bh, (0, HSp - HS)),
                          jnp.pad(bc, (0, HSp - HS))]).reshape(1, 2 * HSp)
    return Wz, bz


# ----------------------------- kernels ------------------------------------


def _sigmoid_via_tanh(v):
    # 1 EUP op instead of 2 (exp + reciprocal); extra mul/add land on VALU slack.
    return 0.5 * (jnp.tanh(0.5 * v) + 1.0)


def lstm_cell_kernel(xh_ref, c_ref, wu_ref, b_ref, h_out_ref, c_out_ref):
    # xh: (TB, D+HSp)  c: (TB, HSp)  wu: (D+HSp, 4*HSp)  b: (1, 4*HSp)
    hsp = c_ref.shape[-1]
    gates = (
        jnp.dot(xh_ref[...], wu_ref[...], preferred_element_type=jnp.float32)
        + b_ref[...].astype(jnp.float32)
    )                                                            # (TB, 4*HSp)
    i_t = _sigmoid_via_tanh(gates[:, 0 * hsp:1 * hsp])
    f_t = _sigmoid_via_tanh(gates[:, 1 * hsp:2 * hsp])
    g_t = jnp.tanh(gates[:, 2 * hsp:3 * hsp])
    o_t = _sigmoid_via_tanh(gates[:, 3 * hsp:4 * hsp])
    c_new = f_t * c_ref[...].astype(jnp.float32) + i_t * g_t
    h_new = o_t * jnp.tanh(c_new)
    h_out_ref[...] = h_new.astype(h_out_ref.dtype)
    c_out_ref[...] = c_new.astype(c_out_ref.dtype)


def init_hidden_kernel(z_ref, w_ref, b_ref, hc_ref):
    # z: (TB, Z)  w: (Z, 2*HSp)  b: (1, 2*HSp)  hc: (TB, 2*HSp)
    hc_ref[...] = (
        jnp.dot(z_ref[...], w_ref[...], preferred_element_type=jnp.float32)
        + b_ref[...].astype(jnp.float32)
    ).astype(hc_ref.dtype)


# ----------------------------- wrappers ------------------------------------


@functools.partial(jax.jit, static_argnames=("hs",))
def custom_lstm_forward(x, h_t, c_t, WU, bias2d, *, hs):
    """One LSTM-cell step with prepared (stacked, lane-padded) params."""
    B, D = x.shape
    HSp = WU.shape[1] // 4
    K = D + HSp
    dtype = x.dtype

    TB = _batch_tile(B, dtype)
    PB = _round_up(B, TB)
    grid = (PB // TB,)

    x_p = _pad_2d(x, PB, D)
    h_p = _pad_2d(h_t.astype(dtype), PB, HSp)
    c_p = _pad_2d(c_t.astype(dtype), PB, HSp)
    xh = jnp.concatenate([x_p, h_p], axis=1)        # (PB, D + HSp), fused by XLA

    isz = jnp.dtype(dtype).itemsize
    cost = pl.CostEstimate(
        flops=2 * PB * K * 4 * HSp + 14 * PB * HSp,
        transcendentals=5 * PB * HSp,               # 5 tanh per state element
        bytes_accessed=isz * (PB * K + PB * HSp + K * 4 * HSp + 4 * HSp
                              + 2 * PB * HSp),
    )

    h_new, c_new = pl.pallas_call(
        lstm_cell_kernel,
        out_shape=(
            jax.ShapeDtypeStruct((PB, HSp), dtype),
            jax.ShapeDtypeStruct((PB, HSp), dtype),
        ),
        grid_spec=pltpu.PrefetchScalarGridSpec(
            num_scalar_prefetch=0,
            grid=grid,
            in_specs=[
                pl.BlockSpec((TB, K), lambda i: (i, 0)),        # [x | h]: batch-tiled
                pl.BlockSpec((TB, HSp), lambda i: (i, 0)),      # c: batch-tiled
                pl.BlockSpec((K, 4 * HSp), lambda i: (0, 0)),   # stacked weights: resident
                pl.BlockSpec((1, 4 * HSp), lambda i: (0, 0)),   # bias: resident
            ],
            out_specs=[
                pl.BlockSpec((TB, HSp), lambda i: (i, 0)),
                pl.BlockSpec((TB, HSp), lambda i: (i, 0)),
            ],
        ),
        compiler_params=pltpu.CompilerParams(
            dimension_semantics=("parallel",),
            vmem_limit_bytes=64 * 1024 * 1024,
        ),
        cost_estimate=cost,
        input_output_aliases={1: 1},    # c state updated in place
    )(xh, c_p, WU, bias2d)

    return h_new[:B, :hs], c_new[:B, :hs]


@functools.partial(jax.jit, static_argnames=("hs",))
def custom_lstm_init_hidden(noise, Wz, bz, *, hs):
    """Fused noise2h / noise2c with prepared params: returns (h0, c0)."""
    B, Z = noise.shape
    HSp2 = Wz.shape[1]
    HSp = HSp2 // 2
    dtype = noise.dtype

    TB = _batch_tile(B, dtype)
    PB = _round_up(B, TB)
    grid = (PB // TB,)

    z_p = _pad_2d(noise, PB, Z)

    isz = jnp.dtype(dtype).itemsize
    cost = pl.CostEstimate(
        flops=2 * PB * Z * HSp2 + PB * HSp2,
        transcendentals=0,
        bytes_accessed=isz * (PB * Z + Z * HSp2 + HSp2 + PB * HSp2),
    )

    hc = pl.pallas_call(
        init_hidden_kernel,
        out_shape=jax.ShapeDtypeStruct((PB, HSp2), dtype),
        grid_spec=pltpu.PrefetchScalarGridSpec(
            num_scalar_prefetch=0,
            grid=grid,
            in_specs=[
                pl.BlockSpec((TB, Z), lambda i: (i, 0)),
                pl.BlockSpec((Z, HSp2), lambda i: (0, 0)),
                pl.BlockSpec((1, HSp2), lambda i: (0, 0)),
            ],
            out_specs=pl.BlockSpec((TB, HSp2), lambda i: (i, 0)),
        ),
        compiler_params=pltpu.CompilerParams(
            dimension_semantics=("parallel",),
            vmem_limit_bytes=64 * 1024 * 1024,
        ),
        cost_estimate=cost,
    )(z_p, Wz, bz)

    return hc[:B, :hs], hc[:B, HSp:HSp + hs]


# ----------------------------- references ----------------------------------


def lstm_reference(x, h_t, c_t, W, U, bias):
    HS = h_t.shape[-1]
    gates = x @ W + h_t @ U + bias
    i_t = jax.nn.sigmoid(gates[:, :HS])
    f_t = jax.nn.sigmoid(gates[:, HS:2 * HS])
    g_t = jnp.tanh(gates[:, 2 * HS:3 * HS])
    o_t = jax.nn.sigmoid(gates[:, 3 * HS:])
    c_new = f_t * c_t + i_t * g_t
    h_new = o_t * jnp.tanh(c_new)
    return h_new, c_new


def init_hidden_reference(noise, wh, bh, wc, bc):
    return noise @ wh.T + bh, noise @ wc.T + bc


# ----------------------------- demo ----------------------------------------


if __name__ == "__main__":
    import math

    B, input_sz, hidden_sz, z_dim = 2, 16, 32, 100
    stdv = 1.0 / math.sqrt(hidden_sz)

    key = jax.random.PRNGKey(0)
    ks = jax.random.split(key, 9)
    x = jax.random.normal(ks[0], (B, input_sz), jnp.float32)
    noise = jax.random.normal(ks[1], (B, z_dim), jnp.float32)

    W = jax.random.uniform(ks[2], (input_sz, 4 * hidden_sz), jnp.float32, -stdv, stdv)
    U = jax.random.uniform(ks[3], (hidden_sz, 4 * hidden_sz), jnp.float32, -stdv, stdv)
    bias = jax.random.uniform(ks[4], (4 * hidden_sz,), jnp.float32, -stdv, stdv)
    # noise2h / noise2c Linear params (PyTorch layout: weight (HS, z_dim), bias (HS,))
    wh = jax.random.uniform(ks[5], (hidden_sz, z_dim), jnp.float32, -stdv, stdv)
    bh = jax.random.uniform(ks[6], (hidden_sz,), jnp.float32, -stdv, stdv)
    wc = jax.random.uniform(ks[7], (hidden_sz, z_dim), jnp.float32, -stdv, stdv)
    bc = jax.random.uniform(ks[8], (hidden_sz,), jnp.float32, -stdv, stdv)

    # one-time parameter prep (stacked / transposed / lane-padded weights)
    WU, bias2d = prepare_forward_params(W, U, bias)
    Wz, bz = prepare_init_params(wh, bh, wc, bc)

    # init_hidden(noise)
    h0, c0 = custom_lstm_init_hidden(noise, Wz, bz, hs=hidden_sz)
    # forward(x)
    h1, c1 = custom_lstm_forward(x, h0, c0, WU, bias2d, hs=hidden_sz)
    jax.block_until_ready((h0, c0, h1, c1))

    # correctness check vs pure-JAX reference
    h0_r, c0_r = init_hidden_reference(noise, wh, bh, wc, bc)
    h1_r, c1_r = lstm_reference(x, h0_r, c0_r, W, U, bias)

    assert h0.shape == (B, hidden_sz) and c0.shape == (B, hidden_sz)
    assert h1.shape == (B, hidden_sz) and c1.shape == (B, hidden_sz)
    assert jnp.allclose(h0, h0_r, atol=1e-3, rtol=1e-3)
    assert jnp.allclose(c0, c0_r, atol=1e-3, rtol=1e-3)
    assert jnp.allclose(h1, h1_r, atol=1e-3, rtol=1e-3)
    assert jnp.allclose(c1, c1_r, atol=1e-3, rtol=1e-3)
    print("KERNEL_OK")
</pallas_src>

<mosaic_0001>
module attributes {stable_mosaic.version = 11 : i64} {
  func.func @init_hidden_kernel(%arg0: i32, %arg1: memref<8x100xf32, #tpu.memory_space<vmem>>, %arg2: memref<100x256xf32, #tpu.memory_space<vmem>>, %arg3: memref<1x256xf32, #tpu.memory_space<vmem>>, %arg4: memref<8x256xf32, #tpu.memory_space<vmem>>) attributes {dimension_semantics = [#tpu.dimension_semantics<parallel>], iteration_bounds = array<i64: 1>, scalar_prefetch = 0 : i64, scratch_operands = 0 : i64, tpu.core_type = #tpu.core_type<tc>, window_params = [{transform_indices = @transform_0, window_bounds = array<i64: 8, 100>}, {pipeline_mode = #tpu.pipeline_mode<synchronous>, transform_indices = @transform_1, window_bounds = array<i64: 100, 256>}, {pipeline_mode = #tpu.pipeline_mode<synchronous>, transform_indices = @transform_2, window_bounds = array<i64: 1, 256>}, {transform_indices = @transform_3, window_bounds = array<i64: 8, 256>}]} {
    %c0 = arith.constant 0 : index
    %c0_0 = arith.constant 0 : index
    %0 = vector.load %arg1[%c0, %c0_0] : memref<8x100xf32, #tpu.memory_space<vmem>>, vector<8x100xf32>
    %c0_1 = arith.constant 0 : index
    %c0_2 = arith.constant 0 : index
    %1 = vector.load %arg2[%c0_1, %c0_2] : memref<100x256xf32, #tpu.memory_space<vmem>>, vector<100x256xf32>
    %cst = arith.constant dense<0.000000e+00> : vector<8x256xf32>
    %2 = tpu.matmul %0, %1, %cst {dimension_numbers = #tpu.dot_dimension_numbers<[1], [0], [0], [1], [0, 0, 1, 1], [], []>} : vector<8x100xf32>, vector<100x256xf32>, vector<8x256xf32> -> vector<8x256xf32>
    %c0_3 = arith.constant 0 : index
    %c0_4 = arith.constant 0 : index
    %3 = vector.load %arg3[%c0_3, %c0_4] : memref<1x256xf32, #tpu.memory_space<vmem>>, vector<1x256xf32>
    %4 = vector.broadcast %3 : vector<1x256xf32> to vector<8x256xf32>
    %5 = arith.addf %2, %4 : vector<8x256xf32>
    %c0_5 = arith.constant 0 : index
    %c0_6 = arith.constant 0 : index
    %6 = vector.load %arg4[%c0_5, %c0_6] : memref<8x256xf32, #tpu.memory_space<vmem>>, vector<8x256xf32>
    tpu.vector_store %arg4[%c0_5, %c0_6], %5 {strides = array<i32>} : memref<8x256xf32, #tpu.memory_space<vmem>>, vector<8x256xf32>,
    return
  }
  func.func @transform_0(%arg0: i32) -> (i32, i32) {
    %c0_i32 = arith.constant 0 : i32
    %c0_i32_0 = arith.constant 0 : i32
    return %arg0, %c0_i32 : i32, i32
  }
  func.func @transform_1(%arg0: i32) -> (i32, i32) {
    %c0_i32 = arith.constant 0 : i32
    %c0_i32_0 = arith.constant 0 : i32
    %c0_i32_1 = arith.constant 0 : i32
    return %c0_i32, %c0_i32_0 : i32, i32
  }
  func.func @transform_2(%arg0: i32) -> (i32, i32) {
    %c0_i32 = arith.constant 0 : i32
    %c0_i32_0 = arith.constant 0 : i32
    %c0_i32_1 = arith.constant 0 : i32
    return %c0_i32, %c0_i32_0 : i32, i32
  }
  func.func @transform_3(%arg0: i32) -> (i32, i32) {
    %c0_i32 = arith.constant 0 : i32
    %c0_i32_0 = arith.constant 0 : i32
    return %arg0, %c0_i32 : i32, i32
  }
}

</mosaic_0001>

<bundles_post_ra>
// kernel: custom_lstm_init_hidden.1
= control target key start
LH: loop header
LB: loop body
LE: loop exit
PB: predicated region body
PF: predicated region fallthrough
CT: control target
= control target key end

     0   :  { %8 = vsyncpa [#allocation3], 0  ;;  %s154_s15 = smov [#allocation2]   ;;  %s155_s17 = smov 256   ;;  %s192_s0 = inlined_call_operand.vmem [shape: f32[8,100], index: 0, kind: input, shape index: {}]   ;;  %s193_s1 = inlined_call_operand.hbm [shape: f32[100,256], index: 1, kind: input, shape index: {}]   ;;  %s194_s2 = inlined_call_operand.vmem [shape: f32[1,256], index: 2, kind: input, shape index: {}]   ;;  %s195_s3 = inlined_call_operand.vmem [shape: f32[8,256], index: 3, kind: output, shape index: {}]  }
   0x1   :  { %s15_s14 = sshll.u32 %s193_s1, 4  ;;  %s17_s16 = sshll.u32 %s154_s15, 4  ;;  %s16_s14 = int_to_ptr.hbm [resolvable:$true] %s15_s14  ;;  %s18_s16 = int_to_ptr.vmem [resolvable:$true] %s17_s16 }
   0x2   :  { %s156_s18 = smov 16  }
   0x3   :  { %23 = dma.hbm_to_vmem [thread:$0]  %s16_s14, 3328, %s18_s16, [#allocation3], %s155_s17, %s155_s17, %s156_s18  }
   0x4   :  { %152 = dma.done.wait [#allocation3], 3328  }
   0x5   :  { %153 = vsyncadd [#allocation3], 4294963968  ;;  %vm67_vm0 = vcmask 1043456   ;;  %v55_v0 = vld [vmem:[#allocation2 + $0xc0] sm:$0xf]  ;;  %v53_v2 = vld [vmem:[#allocation2 + $0xb0] sm:$0xff] }
   0x6   :  { %v56_v1 = vld [vmem:[#allocation2 + $0xc8] sm:$0xf]  ;;  %121 = vmatpush.msk.msra.mxu0 %vm67_vm0, %v55_v0  ;;  %v54_v3 = vld [vmem:[#allocation2 + $0xb8] sm:$0xff]  ;;  %v51_v4 = vld [vmem:[#allocation2 + $0xa0] sm:$0xff]  ;;  %vm63_vm1 = vcmask 818176  }
   0x7   :  { %123 = vmatpush.msk.msra.mxu1 %vm67_vm0, %v56_v1  ;;  %v52_v5 = vld [vmem:[#allocation2 + $0xa8] sm:$0xff]  ;;  %v49_v6 = vld [vmem:[#allocation2 + $0x90] sm:$0xff]  ;;  %v50_v7 = vld [vmem:[#allocation2 + $0x98] sm:$0xff] }
   0x8   :  { %78 = vmatpush.msra.mxu0 %v53_v2  ;;  %v47_v8 = vld [vmem:[#allocation2 + $0x80] sm:$0xff]  ;;  %v48_v9 = vld [vmem:[#allocation2 + $0x88] sm:$0xff]  ;;  %v45_v10 = vld [vmem:[#allocation2 + $0x70] sm:$0xff] }
   0x9   :  { %98 = vmatpush.msra.mxu1 %v54_v3  ;;  %v46_v11 = vld [vmem:[#allocation2 + $0x78] sm:$0xff]  ;;  %v43_v12 = vld [vmem:[#allocation2 + $0x60] sm:$0xff]  ;;  %v44_v13 = vld [vmem:[#allocation2 + $0x68] sm:$0xff] }
   0xa   :  { %79 = vmatpush.msra.mxu0 %v51_v4  ;;  %v41_v14 = vld [vmem:[#allocation2 + $0x50] sm:$0xff]  ;;  %v42_v15 = vld [vmem:[#allocation2 + $0x58] sm:$0xff]  ;;  %v39_v16 = vld [vmem:[#allocation2 + $0x40] sm:$0xff] }
   0xb   :  { %99 = vmatpush.msra.mxu1 %v52_v5  ;;  %v40_v17 = vld [vmem:[#allocation2 + $0x48] sm:$0xff]  ;;  %v37_v18 = vld [vmem:[#allocation2 + $0x30] sm:$0xff]  ;;  %v38_v19 = vld [vmem:[#allocation2 + $0x38] sm:$0xff] }
   0xc   :  { %80 = vmatpush.msra.mxu0 %v49_v6  ;;  %v35_v20 = vld [vmem:[#allocation2 + $0x20] sm:$0xff]  ;;  %v36_v21 = vld [vmem:[#allocation2 + $0x28] sm:$0xff]  ;;  %v33_v22 = vld [vmem:[#allocation2 + $0x10] sm:$0xff] }
   0xd   :  { %100 = vmatpush.msra.mxu1 %v50_v7  ;;  %v34_v23 = vld [vmem:[#allocation2 + $0x18] sm:$0xff]  ;;  %v31_v24 = vld [vmem:[#allocation2] sm:$0xff]  ;;  %v32_v25 = vld [vmem:[#allocation2 + $0x8] sm:$0xff] }
   0xe   :  { %81 = vmatpush.msra.mxu0 %v47_v8  ;;  %v30_v26 = vld [vmem:[%s192_s0] sm:$0xff] }
   0xf   :  { %101 = vmatpush.msra.mxu1 %v48_v9  ;;  %v57_v27 = vld [vmem:[%s194_s2] sm:$0x3] }
  0x10   :  { %82 = vmatpush.msra.mxu0 %v45_v10  ;;  %v59_v28 = vperm.slane %v57_v27, 0  ;;  %v60_v29 = vperm.slane %v57_v27, 1 }
  0x11   :  { %102 = vmatpush.msra.mxu1 %v46_v11 }
  0x12   :  { %83 = vmatpush.msra.mxu0 %v43_v12 }
  0x13   :  { %103 = vmatpush.msra.mxu1 %v44_v13 }
  0x14   :  { %84 = vmatpush.msra.mxu0 %v41_v14 }
  0x15   :  { %104 = vmatpush.msra.mxu1 %v42_v15 }
  0x16   :  { %85 = vmatpush.msra.mxu0 %v39_v16 }
  0x17   :  { %105 = vmatpush.msra.mxu1 %v40_v17 }
  0x18   :  { %86 = vmatpush.msra.mxu0 %v37_v18 }
  0x19   :  { %106 = vmatpush.msra.mxu1 %v38_v19 }
  0x1a   :  { %87 = vmatpush.msra.mxu0 %v35_v20 }
  0x1b   :  { %107 = vmatpush.msra.mxu1 %v36_v21 }
  0x1c   :  { %88 = vmatpush.msra.mxu0 %v33_v22 }
  0x1d   :  { %108 = vmatpush.msra.mxu1 %v34_v23 }
  0x1e   :  { %89 = vmatpush.msra.mxu0 %v31_v24 }
  0x1f   :  { %109 = vmatpush.msra.mxu1 %v32_v25  ;;  %122 = vmatmul.msk.f32.vlgmr.msra.gmra.mxu0 %vm63_vm1, %v30_v26 }
  0x20   :  { %124 = vmatmul.msk.f32.vlgmr.msra.gmra.mxu1 %vm63_vm1, %v30_v26 }
  0x9c   :  { %v91_v30 = vpop.f32.mrf.mxu0 }
  0x9d   :  { %v111_v31 = vpop.f32.mrf.mxu1  ;;  %v92_v32 = vadd.f32 %v91_v30, %v59_v28 }
  0x9e   :  { %v112_v33 = vadd.f32 %v111_v31, %v60_v29 }
  0x9f   :  { %114 = vst [vmem:[%s195_s3] sm:$0xff] %v92_v32 }
  0xa0   :  { %115 = vst [vmem:[%s195_s3 + $0x8] sm:$0xff] %v112_v33 }
  0xa1   :  { %120 = vsyncpa [#allocation3], 1 }

</bundles_post_ra>
